<compile_context>
chip_gen: v5e
topology: v5e:2x2
jax: 0.10.0
libtpu: 0.0.40
codegen_flags: <defaults>
</compile_context>

<pallas_src>
import jax
import jax.numpy as jnp
from jax.experimental import pallas as pl
from jax.experimental.pallas import tpu as pltpu

NUM_CLASSES = 10          # unused: classifier is an empty Sequential (identity)
C, H, W = 32, 12, 12
FLAT = C * H * W          # 4608 = 36 * 128  (lane-aligned)

# Double-buffered in+out VMEM cost = 2 bufs * 2 arrays * TILE_B * 4608 * 4 B.
# TILE_B=128 -> ~9.4 MiB, safely under v5e's 16 MiB default scoped VMEM and
# far more than enough rows to saturate the HBM pipe on v6e/v7x.
_MAX_TILE_B = 128


def _identity_copy_kernel(x_ref, o_ref):
    # features(x) and classifier(x) are identity (empty nn.Sequential):
    # straight passthrough of the flattened activation block.
    o_ref[...] = x_ref[...]


def _pick_tile_b(b: int) -> int:
    """Largest multiple-of-8 divisor of b, capped at _MAX_TILE_B.

    Falls back to the full batch (single block / grid=(1,)) when b is small or
    not divisible by 8 — for small b the whole slab is tiny and one DMA wins.
    """
    if b % 8 != 0 or b <= _MAX_TILE_B:
        return b
    tile = _MAX_TILE_B
    while tile >= 8:
        if b % tile == 0:
            return tile
        tile -= 8
    return b


def alexnet_forward(x_nchw: jax.Array) -> jax.Array:
    """Forward pass of the (empty) AlexNet: identity + view(B, 32*12*12)."""
    b = x_nchw.shape[0]
    assert x_nchw.shape[1:] == (C, H, W), f"expected (B,{C},{H},{W})"
    # Glue: same memory-order flatten as torch's x.view(x.size(0), 32*12*12).
    x_flat = x_nchw.reshape(b, FLAT)

    tile_b = _pick_tile_b(b)
    grid = (b // tile_b,)

    out = pl.pallas_call(
        _identity_copy_kernel,
        out_shape=jax.ShapeDtypeStruct((b, FLAT), x_flat.dtype),
        grid=grid,
        in_specs=[pl.BlockSpec((tile_b, FLAT), lambda i: (i, 0))],
        out_specs=pl.BlockSpec((tile_b, FLAT), lambda i: (i, 0)),
        # Identity: let the output reuse the input's HBM buffer.
        input_output_aliases={0: 0},
        compiler_params=pltpu.CompilerParams(
            dimension_semantics=("parallel",),
        ),
    )(x_flat)
    return out


def alexnet_get_features(x_nchw: jax.Array):
    """Mirror of AlexNet.get_features: returns (classifier(feat), feat)."""
    feat = alexnet_forward(x_nchw)          # features + flatten (identity path)
    return feat, feat                       # classifier is identity too


# TODO(synk): no learnable parameters exist in this module (both Sequentials
# are empty), so there are no weights to initialize.

if __name__ == "__main__":
    key = jax.random.PRNGKey(0)
    # Batch=2, channels/spatial fixed by the forward's view(B, 32*12*12).
    x = jax.random.normal(key, (2, C, H, W), dtype=jnp.float32)

    y = alexnet_forward(x)
    y = jax.block_until_ready(y)

    # Sanity check against the reference semantics (identity + reshape).
    ref = x.reshape(2, FLAT)
    assert y.shape == (2, FLAT), y.shape
    assert jnp.array_equal(y, ref), "mismatch vs. reference forward"

    print("KERNEL_OK")
</pallas_src>

<mosaic_0001>
module attributes {stable_mosaic.version = 11 : i64} {
  func.func @_identity_copy_kernel(%arg0: i32, %arg1: memref<2x4608xf32, #tpu.memory_space<vmem>>, %arg2: memref<2x4608xf32, #tpu.memory_space<vmem>>) attributes {dimension_semantics = [#tpu.dimension_semantics<parallel>], iteration_bounds = array<i64: 1>, scalar_prefetch = 0 : i64, scratch_operands = 0 : i64, tpu.core_type = #tpu.core_type<tc>, window_params = [{transform_indices = @transform_0, window_bounds = array<i64: 2, 4608>}, {transform_indices = @transform_1, window_bounds = array<i64: 2, 4608>}]} {
    %c0 = arith.constant 0 : index
    %c0_0 = arith.constant 0 : index
    %0 = vector.load %arg1[%c0, %c0_0] : memref<2x4608xf32, #tpu.memory_space<vmem>>, vector<2x4608xf32>
    %c0_1 = arith.constant 0 : index
    %c0_2 = arith.constant 0 : index
    %1 = vector.load %arg2[%c0_1, %c0_2] : memref<2x4608xf32, #tpu.memory_space<vmem>>, vector<2x4608xf32>
    tpu.vector_store %arg2[%c0_1, %c0_2], %0 {strides = array<i32>} : memref<2x4608xf32, #tpu.memory_space<vmem>>, vector<2x4608xf32>,
    return
  }
  func.func @transform_0(%arg0: i32) -> (i32, i32) {
    %c0_i32 = arith.constant 0 : i32
    %c0_i32_0 = arith.constant 0 : i32
    return %arg0, %c0_i32 : i32, i32
  }
  func.func @transform_1(%arg0: i32) -> (i32, i32) {
    %c0_i32 = arith.constant 0 : i32
    %c0_i32_0 = arith.constant 0 : i32
    return %arg0, %c0_i32 : i32, i32
  }
}

</mosaic_0001>

<bundles_post_ra>
// kernel: tpu_custom_call.1
= control target key start
LH: loop header
LB: loop body
LE: loop exit
PB: predicated region body
PF: predicated region fallthrough
CT: control target
= control target key end

     0   :  { %6 = vsyncpa [#allocation3], 0  ;;  %s130_s0 = inlined_call_operand.hbm [shape: f32[2,4608], index: 0, kind: input, shape index: {}, may-alias: {0,1}]   ;;  %s131_s1 = inlined_call_operand.hbm [shape: f32[2,4608], index: 1, kind: output, shape index: {}, may-alias: {0,1}]  }
   0x1   :  { %7 = vsyncpa [#allocation4], 0  ;;  %s13_s8 = sshll.u32 %s130_s0, 4  ;;  %s112_s9 = smov [#allocation2]   ;;  %s14_s8 = int_to_ptr.hbm [resolvable:$true] %s13_s8 }
   0x2   :  { %s15_s10 = sshll.u32 %s112_s9, 4  ;;  %s16_s10 = int_to_ptr.vmem [resolvable:$true] %s15_s10 }
   0x3   :  { %18 = dma.hbm_to_vmem [thread:$0]  %s14_s8, 1152, %s16_s10, [#allocation3]  }
   0x4   :  { %108 = dma.done.wait [#allocation3], 1152  }
   0x5   :  { %109 = vsyncadd [#allocation3], 4294966144  ;;  %v23_v0 = vld [vmem:[#allocation2] sm:$0xff]  ;;  %v24_v1 = vld [vmem:[#allocation2 + $0x8] sm:$0xff]  ;;  %s113_s11 = smov [#allocation5]   ;;  %s48_s14 = sshll.u32 %s131_s1, 4  ;;  %s49_s14 = int_to_ptr.hbm [resolvable:$true] %s48_s14 }
   0x6   :  { %v25_v2 = vld [vmem:[#allocation2 + $0x10] sm:$0xff]  ;;  %32 = vst [vmem:[#allocation5] sm:$0xff] %v23_v0  ;;  %v26_v3 = vld [vmem:[#allocation2 + $0x18] sm:$0xff]  ;;  %v27_v4 = vld [vmem:[#allocation2 + $0x20] sm:$0xff]  ;;  %s46_s0 = sshll.u32 %s113_s11, 4  ;;  %s47_s0 = int_to_ptr.vmem [resolvable:$true] %s46_s0 }
   0x7   :  { %33 = vst [vmem:[#allocation5 + $0x8] sm:$0xff] %v24_v1  ;;  %v28_v5 = vld [vmem:[#allocation2 + $0x28] sm:$0xff]  ;;  %v29_v6 = vld [vmem:[#allocation2 + $0x30] sm:$0xff]  ;;  %v30_v7 = vld [vmem:[#allocation2 + $0x38] sm:$0xff] }
   0x8   :  { %34 = vst [vmem:[#allocation5 + $0x10] sm:$0xff] %v25_v2  ;;  %v31_v8 = vld [vmem:[#allocation2 + $0x40] sm:$0xff] }
   0x9   :  { %35 = vst [vmem:[#allocation5 + $0x18] sm:$0xff] %v26_v3 }
   0xa   :  { %36 = vst [vmem:[#allocation5 + $0x20] sm:$0xff] %v27_v4 }
   0xb   :  { %37 = vst [vmem:[#allocation5 + $0x28] sm:$0xff] %v28_v5 }
   0xc   :  { %38 = vst [vmem:[#allocation5 + $0x30] sm:$0xff] %v29_v6 }
   0xd   :  { %39 = vst [vmem:[#allocation5 + $0x38] sm:$0xff] %v30_v7 }
   0xe   :  { %40 = vst [vmem:[#allocation5 + $0x40] sm:$0xff] %v31_v8 }
   0xf   :  { %51 = dma.vmem_to_hbm [thread:$0]  %s47_s0, 1152, %s49_s14, [#allocation4]  }
  0x10   :  { %110 = dma.done.wait [#allocation4], 1152  }
  0x11   :  { %111 = vsyncadd [#allocation4], 4294966144 }
  0x12   :  { %56 = vsyncpa [#allocation3], 1 }
  0x13   :  { %57 = vsyncpa [#allocation4], 1 }

</bundles_post_ra>
